<compile_context>
chip_gen: v6e
topology: v6e:2x2x1
jax: 0.10.0
libtpu: 0.0.40
codegen_flags: <defaults>
</compile_context>

<pallas_src>
import math
import jax
import jax.numpy as jnp
from jax.experimental import pallas as pl
from jax.experimental.pallas import tpu as pltpu


def _build_pe(d_model: int, max_len: int = 600) -> jnp.ndarray:
    """Deterministic positional-encoding buffer, shape (1, max_len, d_model)."""
    position = jnp.arange(0, max_len, dtype=jnp.float32)[:, None]          # (max_len, 1)
    div_term = jnp.exp(
        jnp.arange(0, d_model, 2, dtype=jnp.float32) * (-math.log(10000.0) / d_model)
    )                                                                       # (d_model/2,)
    ang = position * div_term                                               # (max_len, d_model/2)
    pe = jnp.zeros((max_len, d_model), dtype=jnp.float32)
    pe = pe.at[:, 0::2].set(jnp.sin(ang))
    pe = pe.at[:, 1::2].set(jnp.cos(ang))
    return pe[None, :, :]                                                   # (1, max_len, d_model)


def _pe_add_kernel(x_ref, pe_ref, o_ref):
    # x_ref / o_ref: (TM, C) lane-dense row tile.
    # pe_ref:        (1, C)  pe slab, resident across grid steps; sublane-broadcast
    #                over the row tile is free on the VPU.
    o_ref[...] = x_ref[...] + pe_ref[...]


def _choose_fold(d: int) -> int:
    """Smallest k such that (k*d) % 128 == 0 (fold k rows into lanes -> lane-dense C)."""
    return 128 // math.gcd(d, 128)


def _choose_row_tile(R: int, C: int, itemsize: int,
                     target_bytes: int = 4 * 1024 * 1024) -> int:
    """Dtype-aware row tile: ~target_bytes per block, sublane-pack aligned, and
    preferring an even division of R (no ragged tail) with >= 2 grid steps."""
    pack = max(8, 32 // itemsize)                      # 8 f32 / 16 bf16 / 32 int8
    max_tm = max(pack, (target_bytes // (C * itemsize)) // pack * pack)
    if R <= pack:
        return R                                       # tiny: one full-extent block
    # Largest pack-multiple TM that divides R evenly and (if possible) leaves >= 2
    # grid steps so both v7x TensorCores get work.
    hi = min(max_tm, R // 2) if R >= 2 * pack else min(max_tm, R)
    best = 0
    tm = pack
    while tm <= hi:
        if R % tm == 0:
            best = tm
        tm += pack
    if best:
        return best
    if R <= max_tm:
        return R                                       # single full block
    return max_tm                                      # ragged last tile; still correct


def positional_encoding_forward(x: jnp.ndarray, pe: jnp.ndarray) -> jnp.ndarray:
    """x: (B, S, D); pe: (1, max_len, D). Returns x + pe[:, S, :] (eval-mode dropout)."""
    B, S, D = x.shape
    max_len = pe.shape[1]
    if S >= max_len:
        # Match PyTorch: pe[:, S, :] with S >= max_len raises; JAX would silently clamp.
        raise IndexError(
            f"sequence length {S} out of range for pe buffer with max_len {max_len}")

    # Faithful to the module: a SINGLE pe row indexed by the sequence length,
    # broadcast over all (B, S) positions.
    pe_row = pe[0, S, :].astype(x.dtype)                                    # (D,)

    rows = B * S
    k = _choose_fold(D)                                 # fold k rows into lanes
    rows_pad = ((rows + k - 1) // k) * k                # pad rows so folding never
    x2 = x.reshape(rows, D)                             # falls back to masked stores
    if rows_pad != rows:
        x2 = jnp.pad(x2, ((0, rows_pad - rows), (0, 0)))
    R, C = rows_pad // k, k * D
    x2 = x2.reshape(R, C)                               # lane-dense 2-D slab (C % 128 == 0)
    pe_slab = jnp.tile(pe_row, k)[None, :]              # (1, C): one pe_row per folded row

    itemsize = jnp.dtype(x.dtype).itemsize
    TM = _choose_row_tile(R, C, itemsize)
    grid = (pl.cdiv(R, TM),)

    out2 = pl.pallas_call(
        _pe_add_kernel,
        out_shape=jax.ShapeDtypeStruct((R, C), x.dtype),
        grid_spec=pltpu.PrefetchScalarGridSpec(
            num_scalar_prefetch=0,
            grid=grid,
            in_specs=[
                pl.BlockSpec((TM, C), lambda i: (i, 0)),
                pl.BlockSpec((1, C), lambda i: (0, 0)),    # resident pe slab
            ],
            out_specs=pl.BlockSpec((TM, C), lambda i: (i, 0)),
        ),
        input_output_aliases={0: 0},            # reuse x's HBM buffer for the output
        compiler_params=pltpu.CompilerParams(
            dimension_semantics=("parallel",),
            # ~4 MiB blocks, double-buffered in+out (~16 MiB) + tiny pe slab: fits the
            # explicit 32 MiB budget on every generation (v7x: half of physical VMEM).
            vmem_limit_bytes=32 * 1024 * 1024,
        ),
    )(x2, pe_slab)

    out = out2.reshape(rows_pad, D)
    if rows_pad != rows:
        out = out[:rows]
    return out.reshape(B, S, D)


# Recommended entry point: donate x so input_output_aliases={0:0} is a true in-place
# update (no defensive HBM copy of x before the aliased pallas_call).
positional_encoding_forward_jit = jax.jit(positional_encoding_forward, donate_argnums=(0,))


if __name__ == "__main__":
    key = jax.random.PRNGKey(0)

    # Case 1: narrow feature dim (D < 128) -> lane-folding path (D=32, k=4 -> C=128).
    B, S, D = 2, 8, 32
    x = jax.random.normal(key, (B, S, D), dtype=jnp.float32)
    pe = _build_pe(d_model=D, max_len=600)
    ref = x + pe[:, S, :]                       # pe[:, S, :] has shape (1, D), broadcasts
    out = jax.block_until_ready(positional_encoding_forward_jit(x, pe))
    assert out.shape == (B, S, D)
    assert jnp.allclose(out, ref, atol=1e-6), "mismatch vs reference (D=32)"

    # Case 2: lane-aligned feature dim (D % 128 == 0) -> no folding needed.
    B2, S2, D2 = 2, 8, 128
    x_b = jax.random.normal(jax.random.PRNGKey(1), (B2, S2, D2), dtype=jnp.float32)
    pe_b = _build_pe(d_model=D2, max_len=600)
    ref_b = x_b + pe_b[:, S2, :]
    out_b = jax.block_until_ready(positional_encoding_forward_jit(x_b, pe_b))
    assert out_b.shape == (B2, S2, D2)
    assert jnp.allclose(out_b, ref_b, atol=1e-6), "mismatch vs reference (D=128)"

    # Case 3: rows (B*S) not a multiple of the fold factor -> zero-pad path
    # (B=3, S=5, D=32 -> rows=15, k=4 -> pad to 16, then slice back).
    B3, S3, D3 = 3, 5, 32
    x_c = jax.random.normal(jax.random.PRNGKey(2), (B3, S3, D3), dtype=jnp.float32)
    pe_c = _build_pe(d_model=D3, max_len=600)
    ref_c = x_c + pe_c[:, S3, :]
    out_c = jax.block_until_ready(positional_encoding_forward(x_c, pe_c))
    assert out_c.shape == (B3, S3, D3)
    assert jnp.allclose(out_c, ref_c, atol=1e-6), "mismatch vs reference (padded rows)"

    # Case 4: bf16 smoke test (exercises dtype-aware tile math; pe cast to x.dtype).
    B4, S4, D4 = 2, 16, 256
    x_d = jax.random.normal(jax.random.PRNGKey(3), (B4, S4, D4), dtype=jnp.bfloat16)
    pe_d = _build_pe(d_model=D4, max_len=600)
    ref_d = x_d + pe_d[0, S4, :].astype(jnp.bfloat16)
    out_d = jax.block_until_ready(positional_encoding_forward(x_d, pe_d))
    assert out_d.shape == (B4, S4, D4)
    assert jnp.allclose(out_d.astype(jnp.float32), ref_d.astype(jnp.float32),
                        atol=1e-2), "mismatch vs reference (bf16)"

    print("KERNEL_OK")
</pallas_src>

<mosaic_0001>
module attributes {stable_mosaic.version = 11 : i64} {
  func.func @_pe_add_kernel(%arg0: i32, %arg1: memref<4x128xf32, #tpu.memory_space<vmem>>, %arg2: memref<1x128xf32, #tpu.memory_space<vmem>>, %arg3: memref<4x128xf32, #tpu.memory_space<vmem>>) attributes {dimension_semantics = [#tpu.dimension_semantics<parallel>], iteration_bounds = array<i64: 1>, scalar_prefetch = 0 : i64, scratch_operands = 0 : i64, tpu.core_type = #tpu.core_type<tc>, window_params = [{transform_indices = @transform_0, window_bounds = array<i64: 4, 128>}, {pipeline_mode = #tpu.pipeline_mode<synchronous>, transform_indices = @transform_1, window_bounds = array<i64: 1, 128>}, {transform_indices = @transform_2, window_bounds = array<i64: 4, 128>}]} {
    %c0 = arith.constant 0 : index
    %c0_0 = arith.constant 0 : index
    %0 = vector.load %arg1[%c0, %c0_0] : memref<4x128xf32, #tpu.memory_space<vmem>>, vector<4x128xf32>
    %c0_1 = arith.constant 0 : index
    %c0_2 = arith.constant 0 : index
    %1 = vector.load %arg2[%c0_1, %c0_2] : memref<1x128xf32, #tpu.memory_space<vmem>>, vector<1x128xf32>
    %2 = vector.broadcast %1 : vector<1x128xf32> to vector<4x128xf32>
    %3 = arith.addf %0, %2 : vector<4x128xf32>
    %c0_3 = arith.constant 0 : index
    %c0_4 = arith.constant 0 : index
    %4 = vector.load %arg3[%c0_3, %c0_4] : memref<4x128xf32, #tpu.memory_space<vmem>>, vector<4x128xf32>
    tpu.vector_store %arg3[%c0_3, %c0_4], %3 {strides = array<i32>} : memref<4x128xf32, #tpu.memory_space<vmem>>, vector<4x128xf32>,
    return
  }
  func.func @transform_0(%arg0: i32) -> (i32, i32) {
    %c0_i32 = arith.constant 0 : i32
    %c0_i32_0 = arith.constant 0 : i32
    return %arg0, %c0_i32 : i32, i32
  }
  func.func @transform_1(%arg0: i32) -> (i32, i32) {
    %c0_i32 = arith.constant 0 : i32
    %c0_i32_0 = arith.constant 0 : i32
    %c0_i32_1 = arith.constant 0 : i32
    return %c0_i32, %c0_i32_0 : i32, i32
  }
  func.func @transform_2(%arg0: i32) -> (i32, i32) {
    %c0_i32 = arith.constant 0 : i32
    %c0_i32_0 = arith.constant 0 : i32
    return %arg0, %c0_i32 : i32, i32
  }
}

</mosaic_0001>

<bundles_post_ra>
// kernel: tile.7
= control target key start
LH: loop header
LB: loop body
LE: loop exit
PB: predicated region body
PF: predicated region fallthrough
CT: control target
= control target key end

     0   :  { %vm8_vm0 = vcmask 261120   ;;  %s40_s8 = smov 32   ;;  %s41_s9 = smov 64   ;;  %vm14_vm1 = vcmask 1048320   ;;  %vm20_vm2 = vcmask 785920   ;;  %vm26_vm3 = vcmask 523520   ;;  %s58_s0 = inlined_call_operand.vmem [shape: f32[4,32], index: 0, kind: input, shape index: {}]   ;;  %s59_s1 = inlined_call_operand.vmem [shape: f32[1,128], index: 1, kind: output, shape index: {}]  }
   0x1   :  { %v5_v0 = vld [vmem:[%s58_s0] sm:$0xf]  ;;  %s39_s0 = smov 96  }
   0x2   :  { %6 = vst [vmem:[#allocation1] sm:$0xf] %v5_v0 }
   0x9   :  { %v11_v1 = vld [vmem:[#allocation1 + $0x3] sm:$0x1]   ;;  %v23_v2 = vld [vmem:[#allocation1 + $0x1] sm:$0x1]   ;;  %v7_v3 = vld [vmem:[#allocation1] sm:$0x1]  }
   0xa   :  { %12 = vrot.lane.b32.xlu0 %v11_v1, %s39_s0  ;;  %24 = vrot.lane.b32.xlu1 %v23_v2, %s40_s8  ;;  %v17_v4 = vld [vmem:[#allocation1 + $0x2] sm:$0x1]   ;;  %9 = vst.msk [vmem:[#allocation0] sm:$0x1] %vm8_vm0, %v7_v3  }
   0xe   :  { %18 = vrot.lane.b32.xlu0 %v17_v4, %s41_s9 }
  0x7c   :  { %v13_v5 = vpop.permute.xlu0 %12   ;;  %v25_v6 = vpop.permute.xlu1 %24  }
  0x7d   :  { %15 = vst.msk [vmem:[#allocation0] sm:$0x1] %vm14_vm1, %v13_v5  }
  0x80   :  { %v19_v7 = vpop.permute.xlu0 %18  }
  0x81   :  { %21 = vst.msk [vmem:[#allocation0] sm:$0x1] %vm20_vm2, %v19_v7  }
  0x82   :  { %27 = vst.msk [vmem:[#allocation0] sm:$0x1] %vm26_vm3, %v25_v6  }
  0x89   :  { %v32_v8 = vld [vmem:[#allocation0] sm:$0x1] }
  0x8a   :  { %35 = vst [vmem:[%s59_s1] sm:$0x1] %v32_v8 }

// kernel: tile.6
= control target key start
LH: loop header
LB: loop body
LE: loop exit
PB: predicated region body
PF: predicated region fallthrough
CT: control target
= control target key end

     0   :  { %s22_s0 = inlined_call_operand.vmem [shape: f32[32], index: 0, kind: input, shape index: {}]   ;;  %s23_s1 = inlined_call_operand.vmem [shape: f32[4,32], index: 1, kind: output, shape index: {}]  }
   0x1   :  { %v4_v0 = vld [vmem:[%s22_s0] ss:$0 sm:$0xff] }
   0x2   :  { %5 = vst [vmem:[%s23_s1] sm:$0xf] %v4_v0 }

// kernel: positional_encoding_forward.1
= control target key start
LH: loop header
LB: loop body
LE: loop exit
PB: predicated region body
PF: predicated region fallthrough
CT: control target
= control target key end

     0   :  { %s50_s0 = inlined_call_operand.vmem [shape: f32[4,128], index: 0, kind: input, shape index: {}, may-alias: {0,2}]   ;;  %s51_s1 = inlined_call_operand.vmem [shape: f32[1,128], index: 1, kind: input, shape index: {}]   ;;  %s52_s2 = inlined_call_operand.vmem [shape: f32[4,128], index: 2, kind: output, shape index: {}, may-alias: {0,2}]  }
   0x1   :  { %v11_v0 = vld [vmem:[%s50_s0] sm:$0xf] }
   0x2   :  { %v25_v1 = vld [vmem:[%s51_s1] ss:$0 sm:$0xff] }
   0x3   :  { %v19_v2 = vadd.f32 %v25_v1, %v11_v0 }
   0x5   :  { %20 = vst [vmem:[%s52_s2] sm:$0xf] %v19_v2 }

</bundles_post_ra>
